<compile_context>
chip_gen: v5e
topology: v5e:2x2
jax: 0.10.0
libtpu: 0.0.40
codegen_flags: <defaults>
</compile_context>

<pallas_src>
import jax
import jax.numpy as jnp
from jax.experimental import pallas as pl
from jax.experimental.pallas import tpu as pltpu


def _make_kernel(out_dim: int):
    def kernel(x_ref, w1_ref, b1_ref, w2_ref, b2_ref, o_ref):
        # x_ref : (in_dim, tb)   -- batch in lanes
        # w1_ref: (hidden, in_dim)   b1_ref: (hidden, 1)
        # w2_ref: (hidden, 1) if out_dim == 1 else (out_dim, hidden)
        # b2_ref: (out_dim, 1)
        x = x_ref[...].astype(jnp.float32)
        h = jnp.dot(w1_ref[...], x, preferred_element_type=jnp.float32)
        h = jnp.maximum(h + b1_ref[...], 0.0)            # (hidden, tb), VPU ReLU

        if out_dim == 1:
            # Lane-wise multiply + sublane reduce; avoids a degenerate M=1 MXU
            # pass and any cross-lane reduce in front of the store.
            y = jnp.sum(h * w2_ref[...], axis=0, keepdims=True)   # (1, tb)
        else:
            y = jnp.dot(w2_ref[...], h, preferred_element_type=jnp.float32)

        y = y + b2_ref[...]                              # (out_dim, 1) broadcast
        o_ref[...] = y.astype(o_ref.dtype)               # lane-dense store

    return kernel


def simple_model_forward(x, w1, b1, w2, b2, *, tile_b=65536):
    """Forward pass of SimpleModel: relu(x @ W1.T + b1) @ W2.T + b2.

    Weights are in PyTorch nn.Linear layout:
      x : (B, in_dim)
      w1: (hidden, in_dim)   b1: (hidden,)
      w2: (out_dim, hidden)  b2: (out_dim,)
    """
    B, in_dim = x.shape
    hidden, in_dim_w = w1.shape
    assert in_dim_w == in_dim
    out_dim = w2.shape[0]

    # Batch-in-lanes: one upstream transpose, then the kernel streams
    # feature-major (in_dim, tb) blocks (5 sublanes, tb lanes -> lane-dense).
    x_t = x.T                                            # (in_dim, B)

    # Tile sizing: big tiles amortize the ~0.35 us/grid-step overhead.
    # ~24 useful B/row -> 64k rows ≈ 1.5 MB useful per step, and the padded
    # VMEM footprint (x + out double-buffered + intermediates) stays well under
    # the raised 40 MiB limit, which also fits v7x's 64 MiB physical VMEM.
    tb = int(min(tile_b, B))
    if tb < B:
        tb = max(128, (tb // 128) * 128)                 # 128-lane aligned blocks
    grid = (pl.cdiv(B, tb),)

    w1f = w1.astype(jnp.float32)
    b1c = b1.reshape(hidden, 1).astype(jnp.float32)
    b2c = b2.reshape(out_dim, 1).astype(jnp.float32)
    if out_dim == 1:
        w2c = w2.reshape(hidden, 1).astype(jnp.float32)  # column for lane-wise mul
    else:
        w2c = w2.astype(jnp.float32)

    out_t = pl.pallas_call(
        _make_kernel(out_dim),
        out_shape=jax.ShapeDtypeStruct((out_dim, B), x.dtype),
        grid=grid,
        in_specs=[
            pl.BlockSpec((in_dim, tb), lambda i: (0, i)),   # x^T streamed per tile
            pl.BlockSpec(w1f.shape, lambda i: (0, 0)),      # VMEM-resident
            pl.BlockSpec(b1c.shape, lambda i: (0, 0)),      # VMEM-resident
            pl.BlockSpec(w2c.shape, lambda i: (0, 0)),      # VMEM-resident
            pl.BlockSpec(b2c.shape, lambda i: (0, 0)),      # VMEM-resident
        ],
        out_specs=pl.BlockSpec((out_dim, tb), lambda i: (0, i)),  # lane-dense slab
        compiler_params=pltpu.CompilerParams(
            # Independent batch tiles; TODO(synk): verify 2-TC occupancy on v7x
            # via a trace and switch to CORE_PARALLEL / core_map if one TC idles.
            dimension_semantics=("parallel",),
            vmem_limit_bytes=40 * 1024 * 1024,
        ),
    )(x_t, w1f, b1c, w2c, b2c)

    # (out_dim, B) -> (B, out_dim); for out_dim == 1 this is a free reshape.
    if out_dim == 1:
        return out_t.reshape(B, 1)
    return out_t.T


def _reference(x, w1, b1, w2, b2):
    h = jnp.maximum(x.astype(jnp.float32) @ w1.T + b1, 0.0)
    return h @ w2.T + b2


if __name__ == "__main__":
    input_dim, hidden_dim, output_dim = 5, 10, 1

    key = jax.random.PRNGKey(0)
    kx, kw1, kb1, kw2, kb2, kx2 = jax.random.split(key, 6)

    # Deterministic synthetic parameters (PyTorch-like uniform init ranges),
    # stored in PyTorch nn.Linear layout.
    lim1 = 1.0 / (input_dim ** 0.5)
    lim2 = 1.0 / (hidden_dim ** 0.5)
    w1 = jax.random.uniform(kw1, (hidden_dim, input_dim), jnp.float32, -lim1, lim1)
    b1 = jax.random.uniform(kb1, (hidden_dim,), jnp.float32, -lim1, lim1)
    w2 = jax.random.uniform(kw2, (output_dim, hidden_dim), jnp.float32, -lim2, lim2)
    b2 = jax.random.uniform(kb2, (output_dim,), jnp.float32, -lim2, lim2)

    # --- small single-tile check ---
    batch = 8
    x = jax.random.normal(kx, (batch, input_dim), jnp.float32)
    out = jax.block_until_ready(simple_model_forward(x, w1, b1, w2, b2))
    ref = _reference(x, w1, b1, w2, b2)
    assert out.shape == (batch, output_dim)
    assert jnp.allclose(out, ref, atol=1e-5, rtol=1e-5), "f32 single-tile mismatch"

    # --- multi-tile check (grid > 1, 128-lane blocks, partial last tile) ---
    batch2 = 300
    x2 = jax.random.normal(kx2, (batch2, input_dim), jnp.float32)
    out2 = jax.block_until_ready(
        simple_model_forward(x2, w1, b1, w2, b2, tile_b=128)
    )
    ref2 = _reference(x2, w1, b1, w2, b2)
    assert out2.shape == (batch2, output_dim)
    assert jnp.allclose(out2, ref2, atol=1e-5, rtol=1e-5), "f32 tiled mismatch"

    print("KERNEL_OK")
</pallas_src>

<mosaic_0001>
module attributes {stable_mosaic.version = 11 : i64} {
  func.func @kernel(%arg0: i32, %arg1: memref<5x8xf32, #tpu.memory_space<vmem>>, %arg2: memref<10x5xf32, #tpu.memory_space<vmem>>, %arg3: memref<10x1xf32, #tpu.memory_space<vmem>>, %arg4: memref<10x1xf32, #tpu.memory_space<vmem>>, %arg5: memref<1x1xf32, #tpu.memory_space<vmem>>, %arg6: memref<1x8xf32, #tpu.memory_space<vmem>>) attributes {dimension_semantics = [#tpu.dimension_semantics<parallel>], iteration_bounds = array<i64: 1>, scalar_prefetch = 0 : i64, scratch_operands = 0 : i64, tpu.core_type = #tpu.core_type<tc>, window_params = [{transform_indices = @transform_0, window_bounds = array<i64: 5, 8>}, {pipeline_mode = #tpu.pipeline_mode<synchronous>, transform_indices = @transform_1, window_bounds = array<i64: 10, 5>}, {pipeline_mode = #tpu.pipeline_mode<synchronous>, transform_indices = @transform_2, window_bounds = array<i64: 10, 1>}, {pipeline_mode = #tpu.pipeline_mode<synchronous>, transform_indices = @transform_3, window_bounds = array<i64: 10, 1>}, {pipeline_mode = #tpu.pipeline_mode<synchronous>, transform_indices = @transform_4, window_bounds = array<i64: 1, 1>}, {transform_indices = @transform_5, window_bounds = array<i64: 1, 8>}]} {
    %c0 = arith.constant 0 : index
    %c0_0 = arith.constant 0 : index
    %0 = vector.load %arg1[%c0, %c0_0] : memref<5x8xf32, #tpu.memory_space<vmem>>, vector<5x8xf32>
    %c0_1 = arith.constant 0 : index
    %c0_2 = arith.constant 0 : index
    %1 = vector.load %arg2[%c0_1, %c0_2] : memref<10x5xf32, #tpu.memory_space<vmem>>, vector<10x5xf32>
    %cst = arith.constant dense<0.000000e+00> : vector<10x8xf32>
    %2 = tpu.matmul %1, %0, %cst {dimension_numbers = #tpu.dot_dimension_numbers<[1], [0], [0], [1], [0, 0, 1, 1], [], []>} : vector<10x5xf32>, vector<5x8xf32>, vector<10x8xf32> -> vector<10x8xf32>
    %c0_3 = arith.constant 0 : index
    %c0_4 = arith.constant 0 : index
    %3 = vector.load %arg3[%c0_3, %c0_4] : memref<10x1xf32, #tpu.memory_space<vmem>>, vector<10x1xf32>
    %4 = vector.broadcast %3 : vector<10x1xf32> to vector<10x8xf32>
    %5 = arith.addf %2, %4 : vector<10x8xf32>
    %cst_5 = arith.constant 0.000000e+00 : f32
    %6 = vector.broadcast %cst_5 : f32 to vector<10x8xf32>
    %7 = arith.maximumf %5, %6 : vector<10x8xf32>
    %c0_6 = arith.constant 0 : index
    %c0_7 = arith.constant 0 : index
    %8 = vector.load %arg4[%c0_6, %c0_7] : memref<10x1xf32, #tpu.memory_space<vmem>>, vector<10x1xf32>
    %9 = vector.broadcast %8 : vector<10x1xf32> to vector<10x8xf32>
    %10 = arith.mulf %7, %9 : vector<10x8xf32>
    %cst_8 = arith.constant dense<0.000000e+00> : vector<8xf32>
    %11 = vector.multi_reduction <add>, %10, %cst_8 [0] : vector<10x8xf32> to vector<8xf32>
    %12 = vector.shape_cast %11 : vector<8xf32> to vector<1x8xf32>
    %c0_9 = arith.constant 0 : index
    %c0_10 = arith.constant 0 : index
    %13 = vector.load %arg5[%c0_9, %c0_10] : memref<1x1xf32, #tpu.memory_space<vmem>>, vector<1x1xf32>
    %14 = vector.broadcast %13 : vector<1x1xf32> to vector<1x8xf32>
    %15 = arith.addf %12, %14 : vector<1x8xf32>
    %c0_11 = arith.constant 0 : index
    %c0_12 = arith.constant 0 : index
    %16 = vector.load %arg6[%c0_11, %c0_12] : memref<1x8xf32, #tpu.memory_space<vmem>>, vector<1x8xf32>
    tpu.vector_store %arg6[%c0_11, %c0_12], %15 {strides = array<i32>} : memref<1x8xf32, #tpu.memory_space<vmem>>, vector<1x8xf32>,
    return
  }
  func.func @transform_0(%arg0: i32) -> (i32, i32) {
    %c0_i32 = arith.constant 0 : i32
    %c0_i32_0 = arith.constant 0 : i32
    return %c0_i32, %arg0 : i32, i32
  }
  func.func @transform_1(%arg0: i32) -> (i32, i32) {
    %c0_i32 = arith.constant 0 : i32
    %c0_i32_0 = arith.constant 0 : i32
    %c0_i32_1 = arith.constant 0 : i32
    return %c0_i32, %c0_i32_0 : i32, i32
  }
  func.func @transform_2(%arg0: i32) -> (i32, i32) {
    %c0_i32 = arith.constant 0 : i32
    %c0_i32_0 = arith.constant 0 : i32
    %c0_i32_1 = arith.constant 0 : i32
    return %c0_i32, %c0_i32_0 : i32, i32
  }
  func.func @transform_3(%arg0: i32) -> (i32, i32) {
    %c0_i32 = arith.constant 0 : i32
    %c0_i32_0 = arith.constant 0 : i32
    %c0_i32_1 = arith.constant 0 : i32
    return %c0_i32, %c0_i32_0 : i32, i32
  }
  func.func @transform_4(%arg0: i32) -> (i32, i32) {
    %c0_i32 = arith.constant 0 : i32
    %c0_i32_0 = arith.constant 0 : i32
    %c0_i32_1 = arith.constant 0 : i32
    return %c0_i32, %c0_i32_0 : i32, i32
  }
  func.func @transform_5(%arg0: i32) -> (i32, i32) {
    %c0_i32 = arith.constant 0 : i32
    %c0_i32_0 = arith.constant 0 : i32
    return %c0_i32, %arg0 : i32, i32
  }
}

</mosaic_0001>

<bundles_post_ra>
// kernel: tpu_custom_call.1
= control target key start
LH: loop header
LB: loop body
LE: loop exit
PB: predicated region body
PF: predicated region fallthrough
CT: control target
= control target key end

     0   :  { %s219_s0 = inlined_call_operand.vmem [shape: f32[5,8], index: 0, kind: input, shape index: {}]   ;;  %s220_s1 = inlined_call_operand.vmem [shape: f32[10,5], index: 1, kind: input, shape index: {}]   ;;  %s221_s2 = inlined_call_operand.vmem [shape: f32[10,1], index: 2, kind: input, shape index: {}]   ;;  %s222_s3 = inlined_call_operand.vmem [shape: f32[10,1], index: 3, kind: input, shape index: {}]   ;;  %s223_s4 = inlined_call_operand.<no memory space> [shape: f32[1,1], index: 4, kind: input, shape index: {}]   ;;  %s224_s5 = inlined_call_operand.hbm [shape: f32[1,8], index: 5, kind: output, shape index: {}]  }
   0x1   :  { %v10_v0 = vstv %s223_s4 }
   0x2   :  { %11 = vst [vmem:[#allocation2] sm:$0x1] %v10_v0 }
   0x3   :  { %v23_v1 = vld [vmem:[%s219_s0] sm:$0x1f]  ;;  %vm45_vm0 = vcmask 1044480   ;;  %v160_v4 = vmov 0   ;;  %vm38_vm1 = vcmask 39936  }
   0x4   :  { %v74_v2 = vld [vmem:[%s222_s3] sm:$0xff]  ;;  %132 = vset.pattern.permute.xlu1 %v160_v4  ;;  %131 = vset.pattern.permute.xlu0 %v160_v4  ;;  %v25_v6 = vld [vmem:[%s220_s1 + $0x8] sm:$0x3] }
   0x5   :  { %v26_v3 = vld [vmem:[%s221_s2] sm:$0xff]  ;;  %125 = vmatpush.msk.msra.mxu0 %vm45_vm0, %v23_v1  ;;  %128 = vmatpush.msk.msra.mxu1 %vm45_vm0, %v23_v1 }
   0x6   :  { %v24_v5 = vld [vmem:[%s220_s1] sm:$0xff] }
   0x7   :  { %12 = vsyncpa [#allocation4], 0  ;;  %78 = vperm.xlu1 %132, %v74_v2   ;;  %30 = vperm.xlu0 %131, %v26_v3   ;;  %v75_v8 = vld [vmem:[%s222_s3 + $0x8] sm:$0x3]  ;;  %vm88_vm2 = vcmask 64512   ;;  %vm90_vm3 = vcmask 58368  }
   0x8   :  { %126 = vmatmul.msk.f32.vlgmr.msra.gmra.mxu0 %vm38_vm1, %v24_v5  ;;  %127 = vmatmul.msk.f32.vlgmr.msra.gmra.mxu1 %vm38_vm1, %v25_v6  ;;  %v27_v9 = vld [vmem:[%s221_s2 + $0x8] sm:$0x3]  ;;  %s161_s1 = smov [#allocation3]   ;;  %s116_s8 = sshll.u32 %s224_s5, 4  ;;  %vm107_vm4 = vcmask 57344   ;;  %s117_s8 = int_to_ptr.hbm [resolvable:$true] %s116_s8 }
   0x9   :  { %v99_v7 = vld [vmem:[#allocation2] sm:$0x1]  ;;  %133 = vset.pattern.permute.xlu2 %v160_v4  ;;  %s114_s2 = sshll.u32 %s161_s1, 4  ;;  %s115_s2 = int_to_ptr.vmem [resolvable:$true] %s114_s2 }
   0xa   :  { %102 = vperm.xlu2 %133, %v99_v7  }
   0xf   :  { %83 = vperm.xlu1 %132, %v75_v8   ;;  %35 = vperm.xlu0 %131, %v27_v9  }
  0x64   :  { %v103_v28 = vpop.permute.xlu2 %102 }
  0x65   :  { %v105_v31 = vperm.slane %v103_v28, 0 }
  0x79   :  { %v31_v10 = vpop.permute.xlu0 %30  ;;  %v79_v11 = vpop.permute.xlu1 %78 }
  0x81   :  { %v36_v12 = vpop.permute.xlu0 %35  ;;  %v84_v19 = vpop.permute.xlu1 %83 }
  0x85   :  { %v66_v13 = vpop.f32.mrf.mxu0  ;;  %v69_v14 = vpop.f32.mrf.mxu1 }
  0x86   :  { %v67_v15 = vadd.f32 %v66_v13, %v31_v10  ;;  %v70_v16 = vadd.f32 %v69_v14, %v36_v12 }
  0x88   :  { %v72_v17 = vmax.f32 %v67_v15, 0.0  ;;  %v73_v18 = vmax.f32 %v70_v16, 0.0 }
  0x8a   :  { %v86_v20 = vmul.f32 %v79_v11, %v72_v17  ;;  %v87_v21 = vmul.f32 %v84_v19, %v73_v18 }
  0x8c   :  { %v89_v22 = vsel %vm88_vm2, %v86_v20, 0.0  ;;  %v91_v23 = vsel %vm90_vm3, %v87_v21, 0.0 }
  0x8d   :  { %v92_v24 = vadd.f32 %v91_v23, %v89_v22 }
  0x8f   :  { %v93_v25 = vrot.slane %v92_v24, 4 }
  0x91   :  { %v94_v26 = vadd.f32 %v93_v25, %v92_v24 }
  0x93   :  { %v95_v27 = vrot.slane %v94_v26, 2 }
  0x95   :  { %v96_v29 = vadd.f32 %v95_v27, %v94_v26 }
  0x97   :  { %v97_v30 = vrot.slane %v96_v29, 1 }
  0x99   :  { %v98_v32 = vadd.f32 %v97_v30, %v96_v29 }
  0x9b   :  { %v106_v33 = vadd.f32 %v105_v31, %v98_v32 }
  0x9d   :  { %108 = vst.msk [vmem:[#allocation3] sm:$0x1] %vm107_vm4, %v106_v33 }
  0x9e   :  { %119 = dma.vmem_to_hbm [thread:$0]  %s115_s2, 16, %s117_s8, [#allocation4]  }
  0x9f   :  { %158 = dma.done.wait [#allocation4], 16  }
  0xa0   :  { %159 = vsyncadd [#allocation4], 4294967280 }
  0xa1   :  { %124 = vsyncpa [#allocation4], 1 }

</bundles_post_ra>
